<compile_context>
chip_gen: v7x
topology: tpu7x:2x2x1
jax: 0.10.0
libtpu: 0.0.40
codegen_flags: <defaults>
</compile_context>

<pallas_src>
import functools

import jax
import jax.numpy as jnp
from jax.experimental import pallas as pl
from jax.experimental.pallas import tpu as pltpu


def _round_up(n, m):
    return ((n + m - 1) // m) * m


# ---------------------------------------------------------------------------
# Fused Pallas kernel: BOTH discriminator MLPs, all layers, in one matmul chain
# ---------------------------------------------------------------------------
def _fused_discriminator_kernel(x_ref, w0_ref, wrest_ref, b_ref, out_ref, *,
                                n_layers, activation, negative_slope):
    """x_ref: (TB, Din); w0_ref: (Din, W); wrest_ref: (max(L-1,1), W, W);
    b_ref: (L, 1, W); out_ref: (TB, W).

    Net A occupies lanes [0:half), net B lanes [half:W). Layer-0 weight packs both
    nets' columns side by side; later weights are block-diagonal inside (W, W), so a
    single dot per layer runs both networks. Padding lanes remain exactly zero.
    """
    x = x_ref[...]  # (TB, Din) f32
    h = jnp.dot(x, w0_ref[...], preferred_element_type=jnp.float32) + b_ref[0]
    for li in range(1, n_layers):
        # hidden activation (applies to layers 0 .. n_layers-2 only)
        if activation == "relu":
            h = jnp.maximum(h, 0.0)
        else:  # leaky_relu(0.2)
            h = jnp.where(h > 0.0, h, negative_slope * h)
        h = jnp.dot(h, wrest_ref[li - 1],
                    preferred_element_type=jnp.float32) + b_ref[li]
    out_ref[...] = h.astype(out_ref.dtype)


def _forward(x, w0, w_rest, b_all, *, n_layers, activation, negative_slope,
             out_size, half, batch_tile):
    """Single fused pallas_call; slices both nets' outputs out of one buffer."""
    B, Din = x.shape
    W = w0.shape[1]

    kernel = functools.partial(
        _fused_discriminator_kernel,
        n_layers=n_layers,
        activation=activation,
        negative_slope=negative_slope,
    )
    out_shape = jax.ShapeDtypeStruct((B, W), jnp.float32)

    if batch_tile is None:
        # Small batch: gridless, everything resident in VMEM for one shot.
        out = pl.pallas_call(
            kernel,
            out_shape=out_shape,
            in_specs=[pl.BlockSpec(memory_space=pltpu.MemorySpace.VMEM)] * 4,
            out_specs=pl.BlockSpec(memory_space=pltpu.MemorySpace.VMEM),
        )(x, w0, w_rest, b_all)
    else:
        # Larger batch: tile the batch dim; weights use constant index_maps so they
        # stay VMEM-resident; "parallel" lets megacore chips split the grid.
        out = pl.pallas_call(
            kernel,
            out_shape=out_shape,
            grid=(pl.cdiv(B, batch_tile),),
            in_specs=[
                pl.BlockSpec((batch_tile, Din), lambda i: (i, 0)),
                pl.BlockSpec(w0.shape, lambda i: (0, 0)),
                pl.BlockSpec(w_rest.shape, lambda i: (0, 0, 0)),
                pl.BlockSpec(b_all.shape, lambda i: (0, 0, 0)),
            ],
            out_specs=pl.BlockSpec((batch_tile, W), lambda i: (i, 0)),
            compiler_params=pltpu.CompilerParams(
                dimension_semantics=("parallel",)),
        )(x, w0, w_rest, b_all)

    return out[:, :out_size], out[:, half:half + out_size]


_jitted_forward = jax.jit(
    _forward,
    static_argnames=("n_layers", "activation", "negative_slope", "out_size",
                     "half", "batch_tile"),
)


# ---------------------------------------------------------------------------
# Parameter construction (PyTorch nn.Linear default init) + two-net lane packing
# ---------------------------------------------------------------------------
def _linear_init(key, fan_in, fan_out):
    kw, kb = jax.random.split(key)
    bound = 1.0 / float(fan_in) ** 0.5
    w = jax.random.uniform(kw, (fan_in, fan_out), jnp.float32, -bound, bound)
    b = jax.random.uniform(kb, (fan_out,), jnp.float32, -bound, bound)
    return w, b  # W stored (in, out) so y = x @ W + b


def _init_raw_mlp(input_size, sizes, key):
    raw, prev = [], input_size
    for s in sizes:
        key, sub = jax.random.split(key)
        raw.append(_linear_init(sub, prev, s))
        prev = s
    return raw


def _pack_two_nets(input_size, sizes, raw_a, raw_b):
    """Pack net A into lanes [0:half), net B into [half:W), zero elsewhere."""
    L = len(sizes)
    half = max(64, _round_up(max(sizes), 64))   # per-net lane budget
    W = 2 * half                                # multiple of 128 -> lane-dense

    w0 = jnp.zeros((input_size, W), jnp.float32)
    w0 = w0.at[:, :sizes[0]].set(raw_a[0][0])
    w0 = w0.at[:, half:half + sizes[0]].set(raw_b[0][0])

    b_all = jnp.zeros((L, 1, W), jnp.float32)
    b_all = b_all.at[0, 0, :sizes[0]].set(raw_a[0][1])
    b_all = b_all.at[0, 0, half:half + sizes[0]].set(raw_b[0][1])

    w_rest = jnp.zeros((max(L - 1, 1), W, W), jnp.float32)
    prev = sizes[0]
    for li in range(1, L):
        s = sizes[li]
        w_rest = w_rest.at[li - 1, :prev, :s].set(raw_a[li][0])
        w_rest = w_rest.at[li - 1, half:half + prev, half:half + s].set(raw_b[li][0])
        b_all = b_all.at[li, 0, :s].set(raw_a[li][1])
        b_all = b_all.at[li, 0, half:half + s].set(raw_b[li][1])
        prev = s
    return w0, w_rest, b_all, half


# ---------------------------------------------------------------------------
# Discriminator (JAX/Pallas version): two DiscriminatorNets, one fused kernel
# ---------------------------------------------------------------------------
class DiscriminatorPallas:
    def __init__(self, generator_output, input_size, hidden_layers, output_size,
                 configs, key):
        act = configs["generator_hidden_actiovation"]
        if act not in ("relu", "leaky_relu"):
            raise ValueError("Unsupported activation type")
        self._generator_input = generator_output
        self.configs = configs
        self._activation = act
        self._negative_slope = 0.2
        self._output_size = output_size

        sizes = list(hidden_layers) + [output_size]
        self._n_layers = len(sizes)

        key_a, key_b = jax.random.split(key)
        self.raw_params_a = _init_raw_mlp(input_size, sizes, key_a)  # sample disc
        self.raw_params_b = _init_raw_mlp(input_size, sizes, key_b)  # generator disc
        self.w0, self.w_rest, self.b_all, self._half = _pack_two_nets(
            input_size, sizes, self.raw_params_a, self.raw_params_b)

    def __call__(self, x, batch_tile=None):
        if batch_tile is None and x.shape[0] > 512:
            batch_tile = 256  # batch grid: uses both v7x TCs, bounds VMEM
        return _jitted_forward(
            x, self.w0, self.w_rest, self.b_all,
            n_layers=self._n_layers,
            activation=self._activation,
            negative_slope=self._negative_slope,
            out_size=self._output_size,
            half=self._half,
            batch_tile=batch_tile,
        )


# ---------------------------------------------------------------------------
# Pure-JAX reference for correctness checking
# ---------------------------------------------------------------------------
def _ref_mlp(raw_params, x, activation, negative_slope):
    n = len(raw_params)
    for li, (w, b) in enumerate(raw_params):
        x = x @ w + b
        if li < n - 1:
            if activation == "relu":
                x = jnp.maximum(x, 0.0)
            else:
                x = jnp.where(x > 0.0, x, negative_slope * x)
    return x


def _ref_forward(model, x):
    a = _ref_mlp(model.raw_params_a, x, model._activation, model._negative_slope)
    b = _ref_mlp(model.raw_params_b, x, model._activation, model._negative_slope)
    return a, b


if __name__ == "__main__":
    key = jax.random.PRNGKey(0)
    key, k_in, k_in2, k_params = jax.random.split(key, 4)

    # Small shapes consistent with the module: MLP on (batch, input_size).
    batch = 8
    input_size = 16
    hidden_layers = [32, 32]
    output_size = 4
    configs = {"generator_hidden_actiovation": "leaky_relu"}

    model = DiscriminatorPallas(
        generator_output=None,
        input_size=input_size,
        hidden_layers=hidden_layers,
        output_size=output_size,
        configs=configs,
        key=k_params,
    )

    # --- small batch: gridless fused kernel ---
    x = jax.random.normal(k_in, (batch, input_size), dtype=jnp.float32)
    out_a, out_b = model(x)
    out_a = jax.block_until_ready(out_a)
    out_b = jax.block_until_ready(out_b)
    ref_a, ref_b = _ref_forward(model, x)
    assert out_a.shape == (batch, output_size)
    assert out_b.shape == (batch, output_size)
    assert jnp.allclose(out_a, ref_a, atol=1e-5, rtol=1e-5), "sample disc mismatch"
    assert jnp.allclose(out_b, ref_b, atol=1e-5, rtol=1e-5), "generator disc mismatch"

    # --- larger batch: exercises the batch-gridded ("parallel") path ---
    big_batch = 1024
    x2 = jax.random.normal(k_in2, (big_batch, input_size), dtype=jnp.float32)
    out_a2, out_b2 = model(x2)
    out_a2 = jax.block_until_ready(out_a2)
    out_b2 = jax.block_until_ready(out_b2)
    ref_a2, ref_b2 = _ref_forward(model, x2)
    assert out_a2.shape == (big_batch, output_size)
    assert out_b2.shape == (big_batch, output_size)
    assert jnp.allclose(out_a2, ref_a2, atol=1e-5, rtol=1e-5), "sample disc mismatch (grid)"
    assert jnp.allclose(out_b2, ref_b2, atol=1e-5, rtol=1e-5), "generator disc mismatch (grid)"

    print("KERNEL_OK")
</pallas_src>

<mosaic_0001>
module attributes {stable_mosaic.version = 11 : i64} {
  func.func @_fused_discriminator_kernel(%arg0: memref<8x16xf32, #tpu.memory_space<vmem>>, %arg1: memref<16x128xf32, #tpu.memory_space<vmem>>, %arg2: memref<2x128x128xf32, #tpu.memory_space<vmem>>, %arg3: memref<3x1x128xf32, #tpu.memory_space<vmem>>, %arg4: memref<8x128xf32, #tpu.memory_space<vmem>>) attributes {dimension_semantics = [], scalar_prefetch = 0 : i64, scratch_operands = 0 : i64, tpu.core_type = #tpu.core_type<tc>} {
    %c0 = arith.constant 0 : index
    %c0_0 = arith.constant 0 : index
    %0 = vector.load %arg0[%c0, %c0_0] : memref<8x16xf32, #tpu.memory_space<vmem>>, vector<8x16xf32>
    %c0_1 = arith.constant 0 : index
    %c0_2 = arith.constant 0 : index
    %1 = vector.load %arg1[%c0_1, %c0_2] : memref<16x128xf32, #tpu.memory_space<vmem>>, vector<16x128xf32>
    %cst = arith.constant dense<0.000000e+00> : vector<8x128xf32>
    %2 = tpu.matmul %0, %1, %cst {dimension_numbers = #tpu.dot_dimension_numbers<[1], [0], [0], [1], [0, 0, 1, 1], [], []>} : vector<8x16xf32>, vector<16x128xf32>, vector<8x128xf32> -> vector<8x128xf32>
    %c0_3 = arith.constant 0 : index
    %c0_4 = arith.constant 0 : index
    %c0_5 = arith.constant 0 : index
    %3 = vector.load %arg3[%c0_3, %c0_4, %c0_5] : memref<3x1x128xf32, #tpu.memory_space<vmem>>, vector<1x1x128xf32>
    %4 = vector.shape_cast %3 : vector<1x1x128xf32> to vector<1x128xf32>
    %5 = vector.broadcast %4 : vector<1x128xf32> to vector<8x128xf32>
    %6 = arith.addf %2, %5 : vector<8x128xf32>
    %cst_6 = arith.constant 0.000000e+00 : f32
    %7 = vector.broadcast %cst_6 : f32 to vector<8x128xf32>
    %8 = arith.cmpf ogt, %6, %7 : vector<8x128xf32>
    %cst_7 = arith.constant 2.000000e-01 : f32
    %9 = vector.broadcast %cst_7 : f32 to vector<8x128xf32>
    %10 = arith.mulf %9, %6 : vector<8x128xf32>
    %11 = arith.select %8, %6, %10 : vector<8x128xi1>, vector<8x128xf32>
    %c0_8 = arith.constant 0 : index
    %c0_9 = arith.constant 0 : index
    %c0_10 = arith.constant 0 : index
    %12 = vector.load %arg2[%c0_8, %c0_9, %c0_10] : memref<2x128x128xf32, #tpu.memory_space<vmem>>, vector<1x128x128xf32>
    %13 = vector.shape_cast %12 : vector<1x128x128xf32> to vector<128x128xf32>
    %cst_11 = arith.constant dense<0.000000e+00> : vector<8x128xf32>
    %14 = tpu.matmul %11, %13, %cst_11 {dimension_numbers = #tpu.dot_dimension_numbers<[1], [0], [0], [1], [0, 0, 1, 1], [], []>} : vector<8x128xf32>, vector<128x128xf32>, vector<8x128xf32> -> vector<8x128xf32>
    %c1 = arith.constant 1 : index
    %c0_12 = arith.constant 0 : index
    %c0_13 = arith.constant 0 : index
    %15 = vector.load %arg3[%c1, %c0_12, %c0_13] : memref<3x1x128xf32, #tpu.memory_space<vmem>>, vector<1x1x128xf32>
    %16 = vector.shape_cast %15 : vector<1x1x128xf32> to vector<1x128xf32>
    %17 = vector.broadcast %16 : vector<1x128xf32> to vector<8x128xf32>
    %18 = arith.addf %14, %17 : vector<8x128xf32>
    %cst_14 = arith.constant 0.000000e+00 : f32
    %19 = vector.broadcast %cst_14 : f32 to vector<8x128xf32>
    %20 = arith.cmpf ogt, %18, %19 : vector<8x128xf32>
    %cst_15 = arith.constant 2.000000e-01 : f32
    %21 = vector.broadcast %cst_15 : f32 to vector<8x128xf32>
    %22 = arith.mulf %21, %18 : vector<8x128xf32>
    %23 = arith.select %20, %18, %22 : vector<8x128xi1>, vector<8x128xf32>
    %c1_16 = arith.constant 1 : index
    %c0_17 = arith.constant 0 : index
    %c0_18 = arith.constant 0 : index
    %24 = vector.load %arg2[%c1_16, %c0_17, %c0_18] : memref<2x128x128xf32, #tpu.memory_space<vmem>>, vector<1x128x128xf32>
    %25 = vector.shape_cast %24 : vector<1x128x128xf32> to vector<128x128xf32>
    %cst_19 = arith.constant dense<0.000000e+00> : vector<8x128xf32>
    %26 = tpu.matmul %23, %25, %cst_19 {dimension_numbers = #tpu.dot_dimension_numbers<[1], [0], [0], [1], [0, 0, 1, 1], [], []>} : vector<8x128xf32>, vector<128x128xf32>, vector<8x128xf32> -> vector<8x128xf32>
    %c2 = arith.constant 2 : index
    %c0_20 = arith.constant 0 : index
    %c0_21 = arith.constant 0 : index
    %27 = vector.load %arg3[%c2, %c0_20, %c0_21] : memref<3x1x128xf32, #tpu.memory_space<vmem>>, vector<1x1x128xf32>
    %28 = vector.shape_cast %27 : vector<1x1x128xf32> to vector<1x128xf32>
    %29 = vector.broadcast %28 : vector<1x128xf32> to vector<8x128xf32>
    %30 = arith.addf %26, %29 : vector<8x128xf32>
    %c0_22 = arith.constant 0 : index
    %c0_23 = arith.constant 0 : index
    %31 = vector.load %arg4[%c0_22, %c0_23] : memref<8x128xf32, #tpu.memory_space<vmem>>, vector<8x128xf32>
    tpu.vector_store %arg4[%c0_22, %c0_23], %30 {strides = array<i32>} : memref<8x128xf32, #tpu.memory_space<vmem>>, vector<8x128xf32>,
    return
  }
}

</mosaic_0001>

<bundles_post_ra>
// kernel: _forward.1
= control target key start
LH: loop header
LB: loop body
LE: loop exit
PB: predicated region body
PF: predicated region fallthrough
CT: control target
= control target key end

     0   :  { %9 = vsyncpa [#allocation3], 0  ;;  %s698_s0 = inlined_call_operand.hbm [shape: f32[8,16], index: 0, kind: input, shape index: {}]   ;;  %s699_s1 = inlined_call_operand.hbm [shape: f32[16,128], index: 1, kind: input, shape index: {}]   ;;  %s700_s2 = inlined_call_operand.hbm [shape: f32[2,128,128], index: 2, kind: input, shape index: {}]   ;;  %s701_s3 = inlined_call_operand.vmem [shape: f32[3,1,128], index: 3, kind: input, shape index: {}]   ;;  %s702_s4 = inlined_call_operand.vmem [shape: f32[8,128], index: 4, kind: output, shape index: {}]  }
   0x1   :  { %10 = vsyncpa [#allocation5], 0  ;;  %s591_s15 = smov [#allocation4]   ;;  %s521_s19 = scalar_lea.hbm %s699_s1, 256 }
   0x2   :  { %s26_s16 = sshll.u32 %s591_s15, 4  ;;  %p522_p0 = scmp.ne.s32.totalorder %s699_s1, %s521_s19  ;;  %s27_s16 = int_to_ptr.vmem [resolvable:$true] %s26_s16 }
   0x3   :  { %p525_p1 = scmp.lt.u32.totalorder %s521_s19, %s699_s1 }
   0x5   :  { %p527_p2 = pnand %p525_p1, %p522_p0 }
   0x7   :  { %530 = shalt.err (!%p527_p2)
}
   0x8   :  { %s531_s24 = scalar_lea.vmem %s27_s16, 256  ;;  %p536_p4 = scmp.lt.s32.totalorder %s27_s16, %s27_s16 }
   0x9   :  { %p532_p3 = scmp.ne.s32.totalorder %s27_s16, %s531_s24  ;;  %p537_p5 = scmp.lt.s32.totalorder %s531_s24, %s531_s24 }
   0xb   :  { %p538_p6 = por %p537_p5, %p536_p4 }
   0xd   :  { %p539_p7 = pnand %p538_p6, %p532_p3 }
   0xf   :  { %542 = shalt.err (!%p539_p7)
}
  0x10   :  { %s592_s25 = smov 128   ;;  %s593_s26 = smov 8  }
  0x11   :  { %32 = dma.hbm_to_vmem [thread:$0]  %s699_s1, 256, %s27_s16, [#allocation5], %s592_s25, %s592_s25, %s593_s26  }
  0x12   :  { %s594_s29 = smov [#allocation2]   ;;  %s595_s5 = smov [#allocation6]  }
  0x13   :  { %s17_s30 = sshll.u32 %s594_s29, 4  ;;  %s38_s6 = sshll.u32 %s595_s5, 4  ;;  %s18_s30 = int_to_ptr.vmem [resolvable:$true] %s17_s30  ;;  %s39_s6 = int_to_ptr.vmem [resolvable:$true] %s38_s6 }
  0x14   :  { %s543_s9 = scalar_lea.hbm %s698_s0, 128 }
  0x15   :  { %p544_p8 = scmp.ne.s32.totalorder %s698_s0, %s543_s9  ;;  %p547_p9 = scmp.lt.u32.totalorder %s543_s9, %s698_s0 }
  0x17   :  { %p549_p10 = pnand %p547_p9, %p544_p8 }
  0x19   :  { %552 = shalt.err (!%p549_p10)
}
  0x1a   :  { %s553_s1 = scalar_lea.vmem %s18_s30, 128  ;;  %p558_p12 = scmp.lt.s32.totalorder %s18_s30, %s18_s30 }
  0x1b   :  { %p554_p11 = scmp.ne.s32.totalorder %s18_s30, %s553_s1  ;;  %p559_p13 = scmp.lt.s32.totalorder %s553_s1, %s553_s1 }
  0x1d   :  { %p560_p0 = por %p559_p13, %p558_p12 }
  0x1f   :  { %p561_p1 = pnand %p560_p0, %p554_p11 }
  0x21   :  { %564 = shalt.err (!%p561_p1)
}
  0x22   :  { %20 = dma.hbm_to_vmem [thread:$0]  %s698_s0, 128, %s18_s30, [#allocation3]  }
  0x23   :  { %s565_s18 = scalar_lea.hbm %s700_s2, 4096 }
  0x24   :  { %p566_p2 = scmp.ne.s32.totalorder %s700_s2, %s565_s18  ;;  %p569_p3 = scmp.lt.u32.totalorder %s565_s18, %s700_s2 }
  0x26   :  { %p571_p4 = pnand %p569_p3, %p566_p2 }
  0x28   :  { %574 = shalt.err (!%p571_p4)
}
  0x29   :  { %s575_s23 = scalar_lea.vmem %s39_s6, 4096  ;;  %p580_p6 = scmp.lt.s32.totalorder %s39_s6, %s39_s6 }
  0x2a   :  { %p576_p5 = scmp.ne.s32.totalorder %s39_s6, %s575_s23  ;;  %p581_p7 = scmp.lt.s32.totalorder %s575_s23, %s575_s23 }
  0x2c   :  { %p582_p8 = por %p581_p7, %p580_p6 }
  0x2e   :  { %p583_p9 = pnand %p582_p8, %p576_p5 }
  0x30   :  { %586 = shalt.err (!%p583_p9)
}
  0x31   :  { %44 = dma.hbm_to_vmem [thread:$0]  %s700_s2, 4096, %s39_s6, [#allocation5], %s592_s25, %s592_s25, %s593_s26  }
  0x32   :  { %587 = dma.done.wait [#allocation3], 128  }
  0x33   :  { %588 = vsyncadd [#allocation3], 4294967168 }
  0x34   :  { %589 = dma.done.wait [#allocation5], 4352  }
  0x35   :  { %590 = vsyncadd [#allocation5], 4294962944  ;;  %v596_v0 = vmov 0.0|0.0   ;;  %vm597_vm0 = vmmov 0   ;;  %v598_v1 = vmov 0.0   ;;  %v57_v2 = vld [vmem:[#allocation4] sm:$0xff] }
  0x36   :  { %462 = vmatprep.subr.bf16.mxu0 %v596_v0  ;;  %389 = vmatprep.mubr.msk.f32.mxu0 %vm597_vm0, %v598_v1  ;;  %v58_v3 = vld [vmem:[#allocation4 + $0x8] sm:$0xff]  ;;  %v143_v5 = vld [vmem:[#allocation6] sm:$0xff]  ;;  %v144_v6 = vld [vmem:[#allocation6 + $0x8] sm:$0xff]  ;;  %vm66_vm1 = vcmask 130048  }
  0x37   :  { %465 = vmatprep.subr.bf16.mxu1 %v596_v0  ;;  %424 = vmatprep.mubr.msk.f32.mxu1 %vm597_vm0, %v598_v1  ;;  %v463_v4 = vpack.c.bf16 %v58_v3, %v57_v2  ;;  %v145_v7 = vld [vmem:[#allocation6 + $0x10] sm:$0xff]  ;;  %v466_v8 = vpack.c.bf16 %v144_v6, %v143_v5  ;;  %v146_v9 = vld [vmem:[#allocation6 + $0x18] sm:$0xff]  ;;  %v56_v10 = vld [vmem:[#allocation2] sm:$0xff] }
  0x38   :  { %v469_v11 = vpack.c.bf16 %v146_v9, %v145_v7  ;;  %v147_v12 = vld [vmem:[#allocation6 + $0x20] sm:$0xff]  ;;  %v148_v13 = vld [vmem:[#allocation6 + $0x28] sm:$0xff]  ;;  %v149_v15 = vld [vmem:[#allocation6 + $0x30] sm:$0xff] }
  0x39   :  { %464 = vmatpush3.bf16.msra.mxu0 %v463_v4  ;;  %467 = vmatpush3.bf16.msra.mxu1 %v466_v8  ;;  %v472_v14 = vpack.c.bf16 %v148_v13, %v147_v12  ;;  %v150_v16 = vld [vmem:[#allocation6 + $0x38] sm:$0xff]  ;;  %v151_v18 = vld [vmem:[#allocation6 + $0x40] sm:$0xff]  ;;  %v152_v19 = vld [vmem:[#allocation6 + $0x48] sm:$0xff] }
  0x3a   :  { %489 = vmatprep.subr.bf16.mxu0 %v596_v0  ;;  %468 = vmatprep.subr.bf16.mxu1 %v596_v0  ;;  %v475_v17 = vpack.c.bf16 %v150_v16, %v149_v15  ;;  %v478_v20 = vpack.c.bf16 %v152_v19, %v151_v18  ;;  %v153_v21 = vld [vmem:[#allocation6 + $0x50] sm:$0xff]  ;;  %v154_v22 = vld [vmem:[#allocation6 + $0x58] sm:$0xff]  ;;  %v155_v24 = vld [vmem:[#allocation6 + $0x60] sm:$0xff] }
  0x3b   :  { %v481_v23 = vpack.c.bf16 %v154_v22, %v153_v21  ;;  %v156_v25 = vld [vmem:[#allocation6 + $0x68] sm:$0xff]  ;;  %v157_v27 = vld [vmem:[#allocation6 + $0x70] sm:$0xff]  ;;  %v158_v28 = vld [vmem:[#allocation6 + $0x78] sm:$0xff] }
  0x3c   :  { %390 = vmatmul.mubr.msk.f32.vlgmr.msra.gmra.mrb[0].mxu0 %vm66_vm1, %v56_v10  ;;  %v484_v26 = vpack.c.bf16 %v156_v25, %v155_v24  ;;  %v487_v29 = vpack.c.bf16 %v158_v28, %v157_v27  ;;  %v241_v30 = vld [vmem:[#allocation6 + $0x80] sm:$0xff]  ;;  %v242_v31 = vld [vmem:[#allocation6 + $0x88] sm:$0xff]  ;;  %v243_v32 = vld [vmem:[#allocation6 + $0x90] sm:$0xff] }
  0x3d   :  { %459 = vmatprep.mubr.msk.f32.mxu0 %vm597_vm0, %v598_v1  ;;  %470 = vmatpush3.bf16.msra.mxu1 %v469_v11  ;;  %v490_v33 = vpack.c.bf16 %v242_v31, %v241_v30  ;;  %v244_v34 = vld [vmem:[#allocation6 + $0x98] sm:$0xff]  ;;  %v245_v36 = vld [vmem:[#allocation6 + $0xa0] sm:$0xff]  ;;  %v246_v37 = vld [vmem:[#allocation6 + $0xa8] sm:$0xff] }
  0x3e   :  { %471 = vmatprep.subr.bf16.mxu1 %v596_v0  ;;  %v493_v35 = vpack.c.bf16 %v244_v34, %v243_v32  ;;  %v496_v38 = vpack.c.bf16 %v246_v37, %v245_v36  ;;  %v247_v39 = vld [vmem:[#allocation6 + $0xb0] sm:$0xff]  ;;  %v248_v40 = vld [vmem:[#allocation6 + $0xb8] sm:$0xff]  ;;  %v249_v42 = vld [vmem:[#allocation6 + $0xc0] sm:$0xff] }
  0x3f   :  { %491 = vmatpush3.bf16.msra.mxu0 %v490_v33  ;;  %v499_v41 = vpack.c.bf16 %v248_v40, %v247_v39  ;;  %v250_v43 = vld [vmem:[#allocation6 + $0xc8] sm:$0xff]  ;;  %v251_v45 = vld [vmem:[#allocation6 + $0xd0] sm:$0xff]  ;;  %v252_v46 = vld [vmem:[#allocation6 + $0xd8] sm:$0xff] }
  0x40   :  { %492 = vmatprep.subr.bf16.mxu0 %v596_v0  ;;  %v502_v44 = vpack.c.bf16 %v250_v43, %v249_v42  ;;  %v505_v47 = vpack.c.bf16 %v252_v46, %v251_v45  ;;  %v253_v48 = vld [vmem:[#allocation6 + $0xe0] sm:$0xff]  ;;  %v254_v49 = vld [vmem:[#allocation6 + $0xe8] sm:$0xff]  ;;  %v255_v57 = vld [vmem:[#allocation6 + $0xf0] sm:$0xff] }
  0x41   :  { %473 = vmatpush3.bf16.msra.mxu1 %v472_v14  ;;  %v508_v50 = vpack.c.bf16 %v254_v49, %v253_v48  ;;  %v342_v51 = vld [vmem:[%s701_s3] ss:$0 sm:$0xff]  ;;  %v256_v58 = vld [vmem:[#allocation6 + $0xf8] sm:$0xff]  ;;  %v345_v60 = vld [vmem:[%s701_s3 + $0x1] ss:$0 sm:$0xff] }
  0x42   :  { %474 = vmatprep.subr.bf16.mxu1 %v596_v0  ;;  %v511_v59 = vpack.c.bf16 %v256_v58, %v255_v57  ;;  %v347_v2 = vld [vmem:[%s701_s3 + $0x2] ss:$0 sm:$0xff] }
  0x43   :  { %494 = vmatpush3.bf16.msra.mxu0 %v493_v35 }
  0x44   :  { %495 = vmatprep.subr.bf16.mxu0 %v596_v0 }
  0x45   :  { %476 = vmatpush3.bf16.msra.mxu1 %v475_v17 }
  0x46   :  { %477 = vmatprep.subr.bf16.mxu1 %v596_v0 }
  0x47   :  { %497 = vmatpush3.bf16.msra.mxu0 %v496_v38 }
  0x48   :  { %498 = vmatprep.subr.bf16.mxu0 %v596_v0 }
  0x49   :  { %479 = vmatpush3.bf16.msra.mxu1 %v478_v20 }
  0x4a   :  { %480 = vmatprep.subr.bf16.mxu1 %v596_v0 }
  0x4b   :  { %500 = vmatpush3.bf16.msra.mxu0 %v499_v41 }
  0x4c   :  { %501 = vmatprep.subr.bf16.mxu0 %v596_v0 }
  0x4d   :  { %482 = vmatpush3.bf16.msra.mxu1 %v481_v23 }
  0x4e   :  { %483 = vmatprep.subr.bf16.mxu1 %v596_v0 }
  0x4f   :  { %503 = vmatpush3.bf16.msra.mxu0 %v502_v44 }
  0x50   :  { %504 = vmatprep.subr.bf16.mxu0 %v596_v0 }
  0x51   :  { %485 = vmatpush3.bf16.msra.mxu1 %v484_v26 }
  0x52   :  { %486 = vmatprep.subr.bf16.mxu1 %v596_v0 }
  0x53   :  { %506 = vmatpush3.bf16.msra.mxu0 %v505_v47 }
  0x54   :  { %507 = vmatprep.subr.bf16.mxu0 %v596_v0 }
  0x55   :  { %488 = vmatpush3.bf16.msra.mxu1 %v487_v29 }
  0x57   :  { %509 = vmatpush3.bf16.msra.mxu0 %v508_v50 }
  0x58   :  { %510 = vmatprep.subr.bf16.mxu0 %v596_v0 }
  0x5b   :  { %512 = vmatpush3.bf16.msra.mxu0 %v511_v59 }
 0x10f   :  { %v136_v52 = vpop.f32.mrb[0].mxu0 }
 0x110   :  { %v137_v53 = vadd.f32 %v342_v51, %v136_v52  ;;  %v391_v54 = vpop.f32.mrb[1].mxu0 }
 0x112   :  { %v141_v55 = vmul.f32 0.2, %v137_v53  ;;  %vm140_vm2 = vcmp.gt.f32.partialorder %v137_v53, 0.0 }
 0x114   :  { %v142_v56 = vsel %vm140_vm2, %v137_v53, %v141_v55 }
 0x115   :  { %425 = vmatmul.mubr.f32.vlgmr.msra.gmra.mrb[0].mxu1 %v142_v56 }
 0x1e8   :  { %v233_v61 = vpop.f32.mrb[0].mxu1 }
 0x1e9   :  { %v234_v62 = vadd.f32 %v345_v60, %v233_v61  ;;  %v426_v63 = vpop.f32.mrb[1].mxu1 }
 0x1eb   :  { %vm237_vm3 = vcmp.gt.f32.partialorder %v234_v62, 0.0  ;;  %v238_v0 = vmul.f32 0.2, %v234_v62 }
 0x1ed   :  { %v239_v1 = vsel %vm237_vm3, %v234_v62, %v238_v0 }
 0x1ee   :  { %460 = vmatmul.mubr.f32.vlgmr.msra.gmra.mrb[2].mxu0 %v239_v1 }
 0x2c1   :  { %v331_v3 = vpop.f32.mrb[2].mxu0 }
 0x2c2   :  { %v332_v4 = vadd.f32 %v347_v2, %v331_v3  ;;  %v461_v5 = vpop.f32.mrb[3].mxu0 }
 0x2c4   :  { %335 = vst [vmem:[%s702_s4] sm:$0xff] %v332_v4 }
 0x2c5   :  { %340 = vsyncpa [#allocation3], 1 }
 0x2c6   :  { %341 = vsyncpa [#allocation5], 1 }

</bundles_post_ra>
